<compile_context>
chip_gen: v5e
topology: v5e:2x2
jax: 0.10.0
libtpu: 0.0.40
codegen_flags: <defaults>
</compile_context>

<pallas_src>
import jax
import jax.numpy as jnp
from jax import lax
from jax.experimental import pallas as pl
from jax.experimental.pallas import tpu as pltpu

EPS = 1e-8
SIGMA = 0.1  # activation-map sharpness


# ---------------------------------------------------------------------------
# Pallas kernel 1: all-pairs squared cross-product norm (junction / inter-pt
# scoring).  Inputs component-major (3, B, N); output (B, Na, Nb).
# Single grid step: whole batch resident in VMEM.
# ---------------------------------------------------------------------------
def _pairwise_score_kernel(a_ref, b_ref, s_ref):
    ax, ay, az = a_ref[0], a_ref[1], a_ref[2]          # (B, Na)
    bx, by, bz = b_ref[0], b_ref[1], b_ref[2]          # (B, Nb)
    cx = ay[:, :, None] * bz[:, None, :] - az[:, :, None] * by[:, None, :]
    cy = az[:, :, None] * bx[:, None, :] - ax[:, :, None] * bz[:, None, :]
    cz = ax[:, :, None] * by[:, None, :] - ay[:, :, None] * bx[:, None, :]
    s_ref[...] = cx * cx + cy * cy + cz * cz           # (B, Na, Nb) squared norm


def pairwise_cross_score(lines_a, lines_b):
    """lines_a (B,Na,3), lines_b (B,Nb,3) -> squared cross norm (B,Na,Nb)."""
    B, Na, _ = lines_a.shape
    Nb = lines_b.shape[1]
    a_cm = jnp.transpose(lines_a, (2, 0, 1))           # (3, B, Na) component-major
    b_cm = jnp.transpose(lines_b, (2, 0, 1))           # (3, B, Nb)
    return pl.pallas_call(
        _pairwise_score_kernel,
        out_shape=jax.ShapeDtypeStruct((B, Na, Nb), jnp.float32),
        grid=(1,),
        in_specs=[pl.BlockSpec((3, B, Na), lambda i: (0, 0, 0)),
                  pl.BlockSpec((3, B, Nb), lambda i: (0, 0, 0))],
        out_specs=pl.BlockSpec((B, Na, Nb), lambda i: (0, 0, 0)),
        compiler_params=pltpu.CompilerParams(dimension_semantics=("arbitrary",)),
    )(a_cm, b_cm)


# ---------------------------------------------------------------------------
# Pallas kernel 2: activation map.  VPU broadcast FMAs instead of a K=3 MXU
# matmul; output written directly in (B, F, M) layout (M on lanes).
# ---------------------------------------------------------------------------
def _active_map_kernel(l_ref, v_ref, m_ref, act_ref):
    lx, ly, lz = l_ref[0], l_ref[1], l_ref[2]          # (B, M)  line eq components
    vx, vy, vz = v_ref[0], v_ref[1], v_ref[2]          # (B, 3F) axis-major VP comps
    dots = (vx[:, :, None] * lx[:, None, :]
            + vy[:, :, None] * ly[:, None, :]
            + vz[:, :, None] * lz[:, None, :])         # (B, 3F, M)
    ln = jnp.sqrt(lx * lx + ly * ly + lz * lz)[:, None, :]    # (B, 1, M)
    vn = jnp.sqrt(vx * vx + vy * vy + vz * vz)[:, :, None]    # (B, 3F, 1)
    c = jnp.abs(dots) / (ln * vn + EPS)                # normalized incidence residual
    a = jnp.exp(-(c * c) / (2.0 * SIGMA * SIGMA))      # (B, 3F, M)  EUP
    F = a.shape[1] // 3
    amax = jnp.maximum(jnp.maximum(a[:, 0:F, :], a[:, F:2 * F, :]),
                       a[:, 2 * F:3 * F, :])           # max over the 3 frame axes
    act_ref[...] = amax * m_ref[...][:, None, :]       # (B, F, M)


def active_map_pallas(lines_cm, vps_cm, mask):
    """lines_cm (3,B,M), vps_cm (3,B,3F), mask (B,M) -> act (B,F,M)."""
    _, B, M = lines_cm.shape
    K = vps_cm.shape[2]
    F = K // 3
    return pl.pallas_call(
        _active_map_kernel,
        out_shape=jax.ShapeDtypeStruct((B, F, M), jnp.float32),
        grid=(1,),
        in_specs=[pl.BlockSpec((3, B, M), lambda i: (0, 0, 0)),
                  pl.BlockSpec((3, B, K), lambda i: (0, 0, 0)),
                  pl.BlockSpec((B, M), lambda i: (0, 0))],
        out_specs=pl.BlockSpec((B, F, M), lambda i: (0, 0, 0)),
        compiler_params=pltpu.CompilerParams(dimension_semantics=("arbitrary",)),
    )(lines_cm, vps_cm, mask)


# ---------------------------------------------------------------------------
# gpnet_utils reconstructions (glue: reshapes, top-k gathers, frame assembly)
# ---------------------------------------------------------------------------
def _batched_gather(x, idx):
    return jax.vmap(lambda xi, ii: xi[ii])(x, idx)


def segs2lines(segs, focal=1.0):
    ones = jnp.full(segs.shape[:-1] + (1,), focal, segs.dtype)
    p1 = jnp.concatenate([segs[..., 0:2], ones], -1)
    p2 = jnp.concatenate([segs[..., 2:4], ones], -1)
    lines = jnp.cross(p1, p2)
    return lines / (jnp.linalg.norm(lines, axis=-1, keepdims=True) + EPS)


def init_filter_segs(segs, zvp, n_vert_lines, n_hori_lines):
    lines = segs2lines(segs)
    zvp_n = zvp / (jnp.linalg.norm(zvp, axis=-1, keepdims=True) + EPS)
    s = jnp.abs(jnp.einsum('bnk,bk->bn', lines, zvp_n))     # small -> vertical
    _, vidx = lax.top_k(-s, n_vert_lines)
    _, hidx = lax.top_k(s, n_hori_lines)
    return _batched_gather(segs, vidx), _batched_gather(segs, hidx)


def junc_filtering(vsegs, hsegs, n_juncs):
    vlines = segs2lines(vsegs)
    hlines = segs2lines(hsegs)
    B, Nv, _ = vlines.shape
    Nh = hlines.shape[1]
    # Pallas: squared cross norm only; rank in XLA; recompute cross for the
    # n_juncs selected pairs (sqrt is monotone -> identical ranking).
    score_sq = pairwise_cross_score(vlines, hlines).reshape(B, Nv * Nh)
    _, idx = lax.top_k(score_sq, n_juncs)
    vi, hi = idx // Nh, idx % Nh
    sel_vlines = _batched_gather(vlines, vi)
    sel_hlines = _batched_gather(hlines, hi)
    juncs = jnp.cross(sel_vlines, sel_hlines)
    juncs = juncs / (jnp.linalg.norm(juncs, axis=-1, keepdims=True) + EPS)
    return (juncs,
            _batched_gather(vsegs, vi), sel_vlines,
            _batched_gather(hsegs, hi), sel_hlines)


def filter_lines_by_dir(hsegs, hlines, zvp, n_lines):
    zvp_n = zvp / (jnp.linalg.norm(zvp, axis=-1, keepdims=True) + EPS)
    d = jnp.einsum('bnk,bk->bn', hlines, zvp_n)
    _, ip = lax.top_k(d, n_lines)
    _, im = lax.top_k(-d, n_lines)
    return _batched_gather(hsegs, ip), _batched_gather(hsegs, im)


def generate_inter_pts_fused(lines_p, lines_m, n_pts):
    """Both self-pair intersection searches fused into one pallas_call."""
    B, N, _ = lines_p.shape
    stacked = jnp.concatenate([lines_p, lines_m], axis=0)        # (2B, N, 3)
    score_sq = pairwise_cross_score(stacked, stacked)            # (2B, N, N) Pallas
    score_sq = score_sq.reshape(2 * B, N * N)
    _, idx = lax.top_k(score_sq, n_pts)
    ai, bi = idx // N, idx % N
    sel_a = _batched_gather(stacked, ai)
    sel_b = _batched_gather(stacked, bi)
    pts = jnp.cross(sel_a, sel_b)
    pts = pts / (jnp.linalg.norm(pts, axis=-1, keepdims=True) + EPS)
    return pts[:B], pts[B:]


def _dehom(p):
    w = p[..., 2:3]
    w = jnp.where(jnp.abs(w) < EPS, jnp.where(w < 0, -EPS, EPS), w)
    return p[..., 0:2] / w


def generate_frames(zvps, hpts_p, hpts_m, n_frames):
    B, nz, _ = zvps.shape
    npts = hpts_p.shape[1]
    idx = jnp.arange(n_frames)
    z = zvps[:, idx % nz]                                   # (B, F, 3)
    hp = jnp.where((idx % 2 == 0)[None, :, None],
                   hpts_p[:, idx % npts], hpts_m[:, idx % npts])
    u = _dehom(z)                                           # (B, F, 2)
    v = _dehom(hp)
    f2 = jnp.clip(-jnp.sum(u * v, axis=-1), 1e-4, None)     # VP orthogonality -> focal^2
    f = jnp.sqrt(f2)                                        # (B, F)
    dz = jnp.concatenate([u, f[..., None]], -1)
    dz = dz / (jnp.linalg.norm(dz, axis=-1, keepdims=True) + EPS)
    dx = jnp.concatenate([v, f[..., None]], -1)
    dx = dx - jnp.sum(dx * dz, -1, keepdims=True) * dz      # Gram-Schmidt
    dx = dx / (jnp.linalg.norm(dx, axis=-1, keepdims=True) + EPS)
    dy = jnp.cross(dz, dx)
    frames = jnp.stack([dx, dy, dz], axis=-2)               # (B, F, 3, 3) rows = axes
    return frames, f


def generate_active_map(frames, focals, seg_map, seg_mask):
    B, F = focals.shape
    lines = segs2lines(seg_map)                             # (B, M, 3)
    f = focals[..., None, None]
    vps_h = jnp.concatenate([frames[..., 0:2] * f, frames[..., 2:3]], -1)   # (B,F,3,3)
    vps_flat = jnp.transpose(vps_h, (0, 2, 1, 3)).reshape(B, 3 * F, 3)      # axis-major
    vps_cm = jnp.transpose(vps_flat, (0, 2, 1))             # (B, 3, 3F)
    vps_cm = jnp.transpose(vps_cm, (1, 0, 2))               # (3, B, 3F) component-first
    lines_cm = jnp.transpose(lines, (2, 0, 1))              # (3, B, M)
    act = active_map_pallas(lines_cm, vps_cm, seg_mask)     # (B, F, M) Pallas
    return act, None, None


# ---------------------------------------------------------------------------
# FrameSampler (no learnable parameters in the original module)
# ---------------------------------------------------------------------------
class FrameSampler:
    def __init__(self, opt):
        self.n_in_vert_lines = opt.n_in_vert_lines
        self.n_in_hori_lines = opt.n_in_hori_lines
        self.n_juncs = opt.n_juncs
        self.n_hori_lines = opt.n_hori_lines
        self.n_hori_pts = opt.n_hori_pts
        self.n_frames = opt.n_frames

    def __call__(self, segs, zvp, zvps, seg_map, seg_mask, out_dict=None, in_dict=None):
        if out_dict is None:
            out_dict = {}
        vsegs, hsegs = init_filter_segs(segs, zvp,
                                        n_vert_lines=self.n_in_vert_lines,
                                        n_hori_lines=self.n_in_hori_lines)
        out_dict['vsegs'] = vsegs
        out_dict['hsegs'] = hsegs
        juncs, juncs_vsegs, juncs_vlines, juncs_hsegs, juncs_hlines = junc_filtering(
            vsegs, hsegs, n_juncs=self.n_juncs)
        out_dict['juncs'] = juncs
        out_dict['juncs_vsegs'] = juncs_vsegs
        out_dict['juncs_hsegs'] = juncs_hsegs
        out_dict['juncs_vlines'] = juncs_vlines
        out_dict['juncs_hlines'] = juncs_hlines
        hsegs_p, hsegs_m = filter_lines_by_dir(juncs_hsegs, juncs_hlines, zvp,
                                               n_lines=self.n_hori_lines)
        out_dict['hsegs_p'] = hsegs_p
        out_dict['hsegs_m'] = hsegs_m
        hlines_p = segs2lines(hsegs_p, focal=1.0)
        hlines_m = segs2lines(hsegs_m, focal=1.0)
        out_dict['hlines_p'] = hlines_p
        out_dict['hlines_m'] = hlines_m
        hpts_p, hpts_m = generate_inter_pts_fused(hlines_p, hlines_m,
                                                  n_pts=self.n_hori_pts)
        out_dict['hpts_p'] = hpts_p
        out_dict['hpts_m'] = hpts_m
        frames, focals = generate_frames(zvps, hpts_p, hpts_m, n_frames=self.n_frames)
        out_dict['frames'] = frames
        out_dict['focals'] = focals
        act_maps, _, _ = generate_active_map(frames, focals, seg_map, seg_mask)
        out_dict['act_maps'] = act_maps
        # torch.no_grad() equivalent: block gradients through everything stored.
        return jax.tree_util.tree_map(lax.stop_gradient, out_dict)


class Opt:
    n_in_vert_lines = 8
    n_in_hori_lines = 8
    n_juncs = 16
    n_hori_lines = 8
    n_hori_pts = 8
    n_frames = 8


if __name__ == "__main__":
    key = jax.random.PRNGKey(0)
    ks = jax.random.split(key, 5)
    B, N, Z, M = 2, 32, 4, 32
    segs = jax.random.uniform(ks[0], (B, N, 4), jnp.float32, -1.0, 1.0)
    zvp = jnp.concatenate([jax.random.normal(ks[1], (B, 2)) * 0.2,
                           jnp.ones((B, 1))], -1).astype(jnp.float32)
    zvps = jnp.concatenate([jax.random.normal(ks[2], (B, Z, 2)) * 0.2,
                            jnp.ones((B, Z, 1))], -1).astype(jnp.float32)
    seg_map = jax.random.uniform(ks[3], (B, M, 4), jnp.float32, -1.0, 1.0)
    seg_mask = (jax.random.uniform(ks[4], (B, M)) > 0.3).astype(jnp.float32)

    sampler = FrameSampler(Opt())
    out = sampler(segs, zvp, zvps, seg_map, seg_mask)
    jax.block_until_ready(out['act_maps'])

    assert out['vsegs'].shape == (B, Opt.n_in_vert_lines, 4)
    assert out['juncs'].shape == (B, Opt.n_juncs, 3)
    assert out['hpts_p'].shape == (B, Opt.n_hori_pts, 3)
    assert out['hpts_m'].shape == (B, Opt.n_hori_pts, 3)
    assert out['frames'].shape == (B, Opt.n_frames, 3, 3)
    assert out['focals'].shape == (B, Opt.n_frames)
    assert out['act_maps'].shape == (B, Opt.n_frames, M)
    assert bool(jnp.all(jnp.isfinite(out['act_maps'])))
    assert bool(jnp.all(jnp.isfinite(out['frames'])))
    print("KERNEL_OK")
</pallas_src>

<mosaic_0001>
module attributes {stable_mosaic.version = 11 : i64} {
  func.func @_pairwise_score_kernel(%arg0: i32, %arg1: memref<3x2x8xf32, #tpu.memory_space<vmem>>, %arg2: memref<3x2x8xf32, #tpu.memory_space<vmem>>, %arg3: memref<2x8x8xf32, #tpu.memory_space<vmem>>) attributes {dimension_semantics = [#tpu.dimension_semantics<arbitrary>], iteration_bounds = array<i64: 1>, scalar_prefetch = 0 : i64, scratch_operands = 0 : i64, tpu.core_type = #tpu.core_type<tc>, window_params = [{pipeline_mode = #tpu.pipeline_mode<synchronous>, transform_indices = @transform_0, window_bounds = array<i64: 3, 2, 8>}, {pipeline_mode = #tpu.pipeline_mode<synchronous>, transform_indices = @transform_1, window_bounds = array<i64: 3, 2, 8>}, {pipeline_mode = #tpu.pipeline_mode<synchronous>, transform_indices = @transform_2, window_bounds = array<i64: 2, 8, 8>}]} {
    %c0 = arith.constant 0 : index
    %c0_0 = arith.constant 0 : index
    %c0_1 = arith.constant 0 : index
    %0 = vector.load %arg1[%c0, %c0_0, %c0_1] : memref<3x2x8xf32, #tpu.memory_space<vmem>>, vector<1x2x8xf32>
    %1 = vector.shape_cast %0 : vector<1x2x8xf32> to vector<2x8xf32>
    %c1 = arith.constant 1 : index
    %c0_2 = arith.constant 0 : index
    %c0_3 = arith.constant 0 : index
    %2 = vector.load %arg1[%c1, %c0_2, %c0_3] : memref<3x2x8xf32, #tpu.memory_space<vmem>>, vector<1x2x8xf32>
    %3 = vector.shape_cast %2 : vector<1x2x8xf32> to vector<2x8xf32>
    %c2 = arith.constant 2 : index
    %c0_4 = arith.constant 0 : index
    %c0_5 = arith.constant 0 : index
    %4 = vector.load %arg1[%c2, %c0_4, %c0_5] : memref<3x2x8xf32, #tpu.memory_space<vmem>>, vector<1x2x8xf32>
    %5 = vector.shape_cast %4 : vector<1x2x8xf32> to vector<2x8xf32>
    %c0_6 = arith.constant 0 : index
    %c0_7 = arith.constant 0 : index
    %c0_8 = arith.constant 0 : index
    %6 = vector.load %arg2[%c0_6, %c0_7, %c0_8] : memref<3x2x8xf32, #tpu.memory_space<vmem>>, vector<1x2x8xf32>
    %7 = vector.shape_cast %6 : vector<1x2x8xf32> to vector<2x8xf32>
    %c1_9 = arith.constant 1 : index
    %c0_10 = arith.constant 0 : index
    %c0_11 = arith.constant 0 : index
    %8 = vector.load %arg2[%c1_9, %c0_10, %c0_11] : memref<3x2x8xf32, #tpu.memory_space<vmem>>, vector<1x2x8xf32>
    %9 = vector.shape_cast %8 : vector<1x2x8xf32> to vector<2x8xf32>
    %c2_12 = arith.constant 2 : index
    %c0_13 = arith.constant 0 : index
    %c0_14 = arith.constant 0 : index
    %10 = vector.load %arg2[%c2_12, %c0_13, %c0_14] : memref<3x2x8xf32, #tpu.memory_space<vmem>>, vector<1x2x8xf32>
    %11 = vector.shape_cast %10 : vector<1x2x8xf32> to vector<2x8xf32>
    %12 = vector.shape_cast %3 : vector<2x8xf32> to vector<2x8x1xf32>
    %13 = vector.shape_cast %11 : vector<2x8xf32> to vector<2x1x8xf32>
    %14 = vector.broadcast %12 : vector<2x8x1xf32> to vector<2x8x8xf32>
    %15 = vector.broadcast %13 : vector<2x1x8xf32> to vector<2x8x8xf32>
    %16 = arith.mulf %14, %15 : vector<2x8x8xf32>
    %17 = vector.shape_cast %5 : vector<2x8xf32> to vector<2x8x1xf32>
    %18 = vector.shape_cast %9 : vector<2x8xf32> to vector<2x1x8xf32>
    %19 = vector.broadcast %17 : vector<2x8x1xf32> to vector<2x8x8xf32>
    %20 = vector.broadcast %18 : vector<2x1x8xf32> to vector<2x8x8xf32>
    %21 = arith.mulf %19, %20 : vector<2x8x8xf32>
    %22 = arith.subf %16, %21 : vector<2x8x8xf32>
    %23 = vector.shape_cast %5 : vector<2x8xf32> to vector<2x8x1xf32>
    %24 = vector.shape_cast %7 : vector<2x8xf32> to vector<2x1x8xf32>
    %25 = vector.broadcast %23 : vector<2x8x1xf32> to vector<2x8x8xf32>
    %26 = vector.broadcast %24 : vector<2x1x8xf32> to vector<2x8x8xf32>
    %27 = arith.mulf %25, %26 : vector<2x8x8xf32>
    %28 = vector.shape_cast %1 : vector<2x8xf32> to vector<2x8x1xf32>
    %29 = vector.shape_cast %11 : vector<2x8xf32> to vector<2x1x8xf32>
    %30 = vector.broadcast %28 : vector<2x8x1xf32> to vector<2x8x8xf32>
    %31 = vector.broadcast %29 : vector<2x1x8xf32> to vector<2x8x8xf32>
    %32 = arith.mulf %30, %31 : vector<2x8x8xf32>
    %33 = arith.subf %27, %32 : vector<2x8x8xf32>
    %34 = vector.shape_cast %1 : vector<2x8xf32> to vector<2x8x1xf32>
    %35 = vector.shape_cast %9 : vector<2x8xf32> to vector<2x1x8xf32>
    %36 = vector.broadcast %34 : vector<2x8x1xf32> to vector<2x8x8xf32>
    %37 = vector.broadcast %35 : vector<2x1x8xf32> to vector<2x8x8xf32>
    %38 = arith.mulf %36, %37 : vector<2x8x8xf32>
    %39 = vector.shape_cast %3 : vector<2x8xf32> to vector<2x8x1xf32>
    %40 = vector.shape_cast %7 : vector<2x8xf32> to vector<2x1x8xf32>
    %41 = vector.broadcast %39 : vector<2x8x1xf32> to vector<2x8x8xf32>
    %42 = vector.broadcast %40 : vector<2x1x8xf32> to vector<2x8x8xf32>
    %43 = arith.mulf %41, %42 : vector<2x8x8xf32>
    %44 = arith.subf %38, %43 : vector<2x8x8xf32>
    %45 = arith.mulf %22, %22 : vector<2x8x8xf32>
    %46 = arith.mulf %33, %33 : vector<2x8x8xf32>
    %47 = arith.addf %45, %46 : vector<2x8x8xf32>
    %48 = arith.mulf %44, %44 : vector<2x8x8xf32>
    %49 = arith.addf %47, %48 : vector<2x8x8xf32>
    %c0_15 = arith.constant 0 : index
    %c0_16 = arith.constant 0 : index
    %c0_17 = arith.constant 0 : index
    %50 = vector.load %arg3[%c0_15, %c0_16, %c0_17] : memref<2x8x8xf32, #tpu.memory_space<vmem>>, vector<2x8x8xf32>
    tpu.vector_store %arg3[%c0_15, %c0_16, %c0_17], %49 {strides = array<i32>} : memref<2x8x8xf32, #tpu.memory_space<vmem>>, vector<2x8x8xf32>,
    return
  }
  func.func @transform_0(%arg0: i32) -> (i32, i32, i32) {
    %c0_i32 = arith.constant 0 : i32
    %c0_i32_0 = arith.constant 0 : i32
    %c0_i32_1 = arith.constant 0 : i32
    %c0_i32_2 = arith.constant 0 : i32
    return %c0_i32, %c0_i32_0, %c0_i32_1 : i32, i32, i32
  }
  func.func @transform_1(%arg0: i32) -> (i32, i32, i32) {
    %c0_i32 = arith.constant 0 : i32
    %c0_i32_0 = arith.constant 0 : i32
    %c0_i32_1 = arith.constant 0 : i32
    %c0_i32_2 = arith.constant 0 : i32
    return %c0_i32, %c0_i32_0, %c0_i32_1 : i32, i32, i32
  }
  func.func @transform_2(%arg0: i32) -> (i32, i32, i32) {
    %c0_i32 = arith.constant 0 : i32
    %c0_i32_0 = arith.constant 0 : i32
    %c0_i32_1 = arith.constant 0 : i32
    %c0_i32_2 = arith.constant 0 : i32
    return %c0_i32, %c0_i32_0, %c0_i32_1 : i32, i32, i32
  }
}

</mosaic_0001>

<bundles_post_ra>
// kernel: tpu_custom_call.1
= control target key start
LH: loop header
LB: loop body
LE: loop exit
PB: predicated region body
PF: predicated region fallthrough
CT: control target
= control target key end

     0   :  { %7 = vsyncpa [#allocation3], 0  ;;  %s286_s0 = inlined_call_operand.hbm [shape: f32[3,2,8], index: 0, kind: input, shape index: {}]   ;;  %s287_s1 = inlined_call_operand.hbm [shape: f32[3,2,8], index: 1, kind: input, shape index: {}]   ;;  %s288_s2 = inlined_call_operand.hbm [shape: f32[2,8,8], index: 2, kind: output, shape index: {}]  }
   0x1   :  { %8 = vsyncpa [#allocation6], 0 }
   0x2   :  { %9 = vsyncpa [#allocation4], 0  ;;  %s14_s11 = sshll.u32 %s286_s0, 4  ;;  %s253_s12 = smov [#allocation2]   ;;  %s15_s11 = int_to_ptr.hbm [resolvable:$true] %s14_s11 }
   0x3   :  { %s16_s13 = sshll.u32 %s253_s12, 4  ;;  %s27_s16 = sshll.u32 %s287_s1, 4  ;;  %s17_s13 = int_to_ptr.vmem [resolvable:$true] %s16_s13  ;;  %s28_s16 = int_to_ptr.hbm [resolvable:$true] %s27_s16 }
   0x4   :  { %s254_s17 = smov 32   ;;  %s255_s18 = smov 2  }
   0x5   :  { %22 = dma.hbm_to_vmem [thread:$0]  %s15_s11, 96, %s17_s13, [#allocation3], %s254_s17, %s254_s17, %s255_s18  }
   0x6   :  { %s256_s19 = smov [#allocation5]  }
   0x7   :  { %s29_s20 = sshll.u32 %s256_s19, 4  ;;  %s30_s20 = int_to_ptr.vmem [resolvable:$true] %s29_s20 }
   0x8   :  { %35 = dma.hbm_to_vmem [thread:$0]  %s28_s16, 96, %s30_s20, [#allocation6], %s254_s17, %s254_s17, %s255_s18  }
   0x9   :  { %247 = dma.done.wait [#allocation3], 96  }
   0xa   :  { %248 = vsyncadd [#allocation3], 4294967200 }
   0xb   :  { %249 = dma.done.wait [#allocation6], 96  }
   0xc   :  { %250 = vsyncadd [#allocation6], 4294967200  ;;  %v55_v0 = vlaneseq  ;;  %v48_v2 = vld [vmem:[#allocation2 + $0x4] sm:$0x3]  ;;  %v46_v3 = vld [vmem:[#allocation2 + $0x2] sm:$0x3] }
   0xd   :  { %v44_v4 = vld [vmem:[#allocation2] sm:$0x3]  ;;  %v76_v5 = vperm.slane %v48_v2, 0  ;;  %v54_v6 = vperm.slane %v46_v3, 0  ;;  %v83_v8 = vperm.slane %v48_v2, 1  ;;  %v61_v9 = vperm.slane %v46_v3, 1 }
   0xe   :  { %v56_v1 = vshrl.u32 %v55_v0, 7  ;;  %v108_v7 = vperm.slane %v44_v4, 0  ;;  %v115_v10 = vperm.slane %v44_v4, 1  ;;  %v51_v11 = vld [vmem:[#allocation5 + $0x2] sm:$0x3]  ;;  %vm142_vm0 = vcmask 64512  }
   0xf   :  { %v53_v12 = vld [vmem:[#allocation5 + $0x4] sm:$0x3]  ;;  %v49_v13 = vld [vmem:[#allocation5] sm:$0x3]  ;;  %v92_v15 = vperm.slane %v51_v11, 0  ;;  %v91_v28 = vrot.slane %v51_v11, 1 }
  0x10   :  { %173 = vset.pattern.permute.xlu1 %v56_v1  ;;  %172 = vset.pattern.permute.xlu0 %v56_v1  ;;  %v70_v14 = vperm.slane %v53_v12, 0  ;;  %v102_v17 = vperm.slane %v49_v13, 0  ;;  %v69_v22 = vrot.slane %v53_v12, 1  ;;  %v101_v23 = vrot.slane %v49_v13, 1  ;;  %s257_s0 = smov [#allocation7]   ;;  %s151_s23 = sshll.u32 %s288_s2, 4  ;;  %s152_s23 = int_to_ptr.hbm [resolvable:$true] %s151_s23 }
  0x11   :  { %174 = vset.pattern.permute.xlu2 %v56_v1  ;;  %v93_v37 = vperm.slane %v91_v28, 0  ;;  %s149_s1 = sshll.u32 %s257_s0, 4  ;;  %s258_s24 = smov 128   ;;  %s150_s1 = int_to_ptr.vmem [resolvable:$true] %s149_s1 }
  0x12   :  { %v71_v32 = vperm.slane %v69_v22, 0  ;;  %v103_v36 = vperm.slane %v101_v23, 0  ;;  %s259_s25 = smov 8  }
  0x18   :  { %81 = vperm.xlu1 %173, %v76_v5   ;;  %59 = vperm.xlu0 %172, %v54_v6  }
  0x19   :  { %113 = vperm.xlu2 %174, %v108_v7  }
  0x20   :  { %88 = vperm.xlu1 %173, %v83_v8   ;;  %66 = vperm.xlu0 %172, %v61_v9  }
  0x21   :  { %120 = vperm.xlu2 %174, %v115_v10  }
  0x73   :  { %v114_v16 = vpop.permute.xlu2 %113 }
  0x74   :  { %v122_v18 = vmul.f32 %v114_v16, %v70_v14  ;;  %v126_v19 = vmul.f32 %v114_v16, %v92_v15 }
  0x7b   :  { %v121_v35 = vpop.permute.xlu2 %120 }
  0x7c   :  { %v123_v40 = vmul.f32 %v121_v35, %v71_v32  ;;  %v127_v47 = vmul.f32 %v121_v35, %v93_v37 }
  0x8a   :  { %v82_v20 = vpop.permute.xlu1 %81  ;;  %v60_v21 = vpop.permute.xlu0 %59 }
  0x8b   :  { %v96_v24 = vmul.f32 %v92_v15, %v82_v20  ;;  %v106_v25 = vmul.f32 %v102_v17, %v82_v20  ;;  %v74_v26 = vmul.f32 %v70_v14, %v60_v21  ;;  %v128_v27 = vmul.f32 %v102_v17, %v60_v21 }
  0x8d   :  { %v124_v29 = vsub.f32 %v106_v25, %v122_v18  ;;  %v98_v30 = vsub.f32 %v74_v26, %v96_v24  ;;  %v130_v31 = vsub.f32 %v126_v19, %v128_v27 }
  0x8f   :  { %v134_v33 = vmul.f32 %v124_v29, %v124_v29  ;;  %v132_v34 = vmul.f32 %v98_v30, %v98_v30  ;;  %v138_v39 = vmul.f32 %v130_v31, %v130_v31 }
  0x91   :  { %v136_v38 = vadd.f32 %v134_v33, %v132_v34 }
  0x92   :  { %v89_v41 = vpop.permute.xlu1 %88  ;;  %v67_v42 = vpop.permute.xlu0 %66 }
  0x93   :  { %v140_v43 = vadd.f32 %v138_v39, %v136_v38  ;;  %v97_v44 = vmul.f32 %v93_v37, %v89_v41  ;;  %v107_v45 = vmul.f32 %v103_v36, %v89_v41  ;;  %v75_v46 = vmul.f32 %v71_v32, %v67_v42 }
  0x94   :  { %v129_v48 = vmul.f32 %v103_v36, %v67_v42 }
  0x95   :  { %143 = vst.msk [vmem:[#allocation7] sm:$0xff] %vm142_vm0, %v140_v43  ;;  %v125_v49 = vsub.f32 %v107_v45, %v123_v40  ;;  %v99_v50 = vsub.f32 %v75_v46, %v97_v44 }
  0x96   :  { %v131_v51 = vsub.f32 %v127_v47, %v129_v48 }
  0x97   :  { %v135_v52 = vmul.f32 %v125_v49, %v125_v49  ;;  %v133_v53 = vmul.f32 %v99_v50, %v99_v50 }
  0x98   :  { %v139_v55 = vmul.f32 %v131_v51, %v131_v51 }
  0x99   :  { %v137_v54 = vadd.f32 %v135_v52, %v133_v53 }
  0x9b   :  { %v141_v56 = vadd.f32 %v139_v55, %v137_v54 }
  0x9d   :  { %144 = vst.msk [vmem:[#allocation7 + $0x8] sm:$0xff] %vm142_vm0, %v141_v56 }
  0x9e   :  { %157 = dma.vmem_to_hbm [thread:$0]  %s150_s1, 256, %s152_s23, [#allocation4], %s258_s24, %s258_s24, %s259_s25  }
  0x9f   :  { %251 = dma.done.wait [#allocation4], 256  }
  0xa0   :  { %252 = vsyncadd [#allocation4], 4294967040 }
  0xa1   :  { %162 = vsyncpa [#allocation3], 1 }
  0xa2   :  { %163 = vsyncpa [#allocation6], 1 }
  0xa3   :  { %164 = vsyncpa [#allocation4], 1 }

</bundles_post_ra>
